<compile_context>
chip_gen: v5e
topology: v5e:2x2
jax: 0.10.0
libtpu: 0.0.40
codegen_flags: <defaults>
</compile_context>

<pallas_src>
import functools

import jax
import jax.numpy as jnp
from jax import lax
from jax.experimental import pallas as pl
from jax.experimental.pallas import tpu as pltpu

K = 3  # ShortConvolution default kernel size


def base_conv_kernel(bw_ref, u_ref, w_ip_ref, b_ip_ref, w_conv_ref, b_conv_ref,
                     w_out_ref, b_out_ref, o_ref, *, seq_len, d_model):
    u_f32 = u_ref[...]                                 # (TM, D) f32 (residual uses this)
    TM = u_f32.shape[0]
    D = d_model
    u_bf = u_f32.astype(jnp.bfloat16)                  # matmul LHS only

    # Fused in_proj | projection: one (TM, 2D) MXU matmul, bf16 operands, f32 accumulation.
    up = jnp.dot(u_bf, w_ip_ref[...], preferred_element_type=jnp.float32) + b_ip_ref[...]
    u_in = up[:, :D]                                   # in_proj(u)
    u_proj = up[:, D:]                                 # projection(u)

    # Causal depthwise conv over the sequence axis:
    #   conv[t, d] = sum_k w_conv[k, d] * u_in[t - (K-1-k), d]   (zero for t - shift < 0)
    # Multiple sequences are fused along the row axis, so mask with (row % L) >= shift.
    row = lax.broadcasted_iota(jnp.int32, (TM, 1), 0) % seq_len
    acc = u_in * w_conv_ref[K - 1, :]                  # shift == 0 tap
    for k in range(K - 1):
        shift = K - 1 - k
        xs = pltpu.roll(u_in, shift, axis=0)           # XLU shift toward larger t
        xs = jnp.where(row >= shift, xs, 0.0)          # zero wrapped / cross-sequence rows
        acc = acc + xs * w_conv_ref[k, :]
    u_conv = acc + b_conv_ref[...]

    # out_proj(u_conv * u_proj): gate math in f32, matmul operands in bf16, f32 accumulation.
    gate = (u_conv * u_proj).astype(jnp.bfloat16)
    y = jnp.dot(gate, w_out_ref[...], preferred_element_type=jnp.float32) + b_out_ref[...]

    # resid branch mix in f32 (full-precision u), stored in the output dtype.
    o_ref[...] = (bw_ref[0] * y + bw_ref[1] * u_f32).astype(o_ref.dtype)


def _pick_row_tiling(B, L, D, target_rows, min_grid_steps):
    """Choose nb (whole sequences per tile) and the grid length (with batch padding)."""
    # ~32 B/element of VMEM working set per row tile (double-buffered f32 in + bf16 out,
    # f32 `up` / conv / gate temporaries); keep the tile well under the v7x 64 MiB budget.
    max_rows_vmem = max(L, (24 << 20) // (32 * D))
    nb = max(1, min(target_rows, max_rows_vmem) // L)
    nb = min(nb, B)
    # Keep enough grid steps for prefetch/writeback overlap and for v7x's two TensorCores.
    steps_wanted = min(min_grid_steps, B)
    if pl.cdiv(B, nb) < steps_wanted:
        nb = max(1, B // steps_wanted)
    grid_steps = pl.cdiv(B, nb)
    return nb, grid_steps


def base_conv_forward(u, params, *, target_rows=2048, min_grid_steps=4,
                      out_dtype=jnp.bfloat16):
    B, L, D = u.shape
    assert D % 128 == 0, "d_model must be a multiple of 128 for the fused (D,2D) lane split"
    bf16 = jnp.bfloat16
    f32 = jnp.float32

    # Row tiling: each grid step processes `nb` whole sequences (TM = nb * L rows), so the
    # causal conv needs no halo rows.  Pad the batch with zero sequences instead of degrading
    # nb (zero sequences are independent thanks to the (row % L) mask).
    nb, grid_steps = _pick_row_tiling(B, L, D, target_rows, min_grid_steps)
    B_pad = nb * grid_steps
    if B_pad != B:
        u = jnp.concatenate([u, jnp.zeros((B_pad - B, L, D), u.dtype)], axis=0)
    TM = nb * L
    rows = B_pad * L
    grid = (grid_steps,)

    # f32 input straight into the kernel (no separate bf16 cast pass over u).
    u2 = u.reshape(rows, D).astype(f32)

    # Small one-off weight prep (bf16 matmul operands; accumulation stays f32 in-kernel).
    w_ip = jnp.concatenate([params["w_in"].T, params["w_proj"].T], axis=1).astype(bf16)  # (D, 2D)
    b_ip = jnp.concatenate([params["b_in"], params["b_proj"]]).reshape(1, 2 * D).astype(f32)
    w_out_t = params["w_out"].T.astype(bf16)             # (D, D)
    b_out = params["b_out"].reshape(1, D).astype(f32)
    w_conv = params["w_conv"].astype(f32)                 # (K, D)
    b_conv = params["b_conv"].reshape(1, D).astype(f32)
    bw = params["branch_weights"].astype(f32)             # (2,)

    kernel = functools.partial(base_conv_kernel, seq_len=L, d_model=D)
    full = lambda shape: pl.BlockSpec(shape, lambda i: (0, 0))
    # TODO(synk): single-buffer the constant weight slabs (pipeline_mode=pl.Buffered(1)) once
    # D is large enough that their double-buffered copies compete with TM for VMEM.

    out = pl.pallas_call(
        kernel,
        out_shape=jax.ShapeDtypeStruct((rows, D), out_dtype),
        grid=grid,
        in_specs=[
            pl.BlockSpec(memory_space=pltpu.MemorySpace.SMEM),  # branch_weights (2,)
            pl.BlockSpec((TM, D), lambda i: (i, 0)),            # u (f32), row-tiled
            full((D, 2 * D)),                                   # fused w_in|w_proj (bf16)
            full((1, 2 * D)),                                   # fused b_in|b_proj
            full((K, D)),                                       # w_conv
            full((1, D)),                                       # b_conv
            full((D, D)),                                       # w_out (bf16)
            full((1, D)),                                       # b_out
        ],
        out_specs=pl.BlockSpec((TM, D), lambda i: (i, 0)),
        compiler_params=pltpu.CompilerParams(
            dimension_semantics=("parallel",),
            vmem_limit_bytes=48 * 1024 * 1024,
        ),
    )(bw, u2, w_ip, b_ip, w_conv, b_conv, w_out_t, b_out)

    return out.reshape(B_pad, L, D)[:B]


def base_conv_reference(u, params):
    """Pure-JAX f32 reference matching the PyTorch forward."""
    B, L, D = u.shape
    u_in = u @ params["w_in"].T + params["b_in"]
    xpad = jnp.pad(u_in, ((0, 0), (K - 1, 0), (0, 0)))
    u_conv = sum(params["w_conv"][k] * xpad[:, k:k + L, :] for k in range(K)) + params["b_conv"]
    u_proj = u @ params["w_proj"].T + params["b_proj"]
    y = (u_conv * u_proj) @ params["w_out"].T + params["b_out"]
    bw = params["branch_weights"]
    return bw[0] * y + bw[1] * u


def init_params(key, d_model):
    ks = jax.random.split(key, 8)
    scale = 0.02
    params = {
        "w_in":   scale * jax.random.normal(ks[0], (d_model, d_model), jnp.float32),
        "b_in":   scale * jax.random.normal(ks[1], (d_model,), jnp.float32),
        "w_proj": scale * jax.random.normal(ks[2], (d_model, d_model), jnp.float32),
        "b_proj": scale * jax.random.normal(ks[3], (d_model,), jnp.float32),
        "w_out":  scale * jax.random.normal(ks[4], (d_model, d_model), jnp.float32),
        "b_out":  scale * jax.random.normal(ks[5], (d_model,), jnp.float32),
        "w_conv": scale * jax.random.normal(ks[6], (K, d_model), jnp.float32),
        "b_conv": scale * jax.random.normal(ks[7], (d_model,), jnp.float32),
        # BaseConv.__init__: branch_weights = zeros(2); branch_weights[0] = 1
        "branch_weights": jnp.array([1.0, 0.0], jnp.float32),
    }
    return params


if __name__ == "__main__":
    B, L, D = 2, 16, 128   # batch, sequence (l_max), d_model
    key = jax.random.PRNGKey(0)
    ku, kp = jax.random.split(key)
    u = jax.random.normal(ku, (B, L, D), jnp.float32)
    params = init_params(kp, D)

    out = base_conv_forward(u, params)
    out = jax.block_until_ready(out)

    ref = base_conv_reference(u, params)
    assert out.shape == (B, L, D)
    out_f32 = out.astype(jnp.float32)
    err = float(jnp.max(jnp.abs(out_f32 - ref)))
    assert jnp.allclose(out_f32, ref, rtol=2e-2, atol=2e-2), err
    print("KERNEL_OK")
</pallas_src>

<mosaic_0001>
module attributes {stable_mosaic.version = 11 : i64} {
  func.func @base_conv_kernel(%arg0: i32, %arg1: memref<2xf32, #tpu.memory_space<smem>>, %arg2: memref<16x128xf32, #tpu.memory_space<vmem>>, %arg3: memref<128x256xbf16, #tpu.memory_space<vmem>>, %arg4: memref<1x256xf32, #tpu.memory_space<vmem>>, %arg5: memref<3x128xf32, #tpu.memory_space<vmem>>, %arg6: memref<1x128xf32, #tpu.memory_space<vmem>>, %arg7: memref<128x128xbf16, #tpu.memory_space<vmem>>, %arg8: memref<1x128xf32, #tpu.memory_space<vmem>>, %arg9: memref<16x128xbf16, #tpu.memory_space<vmem>>) attributes {dimension_semantics = [#tpu.dimension_semantics<parallel>], iteration_bounds = array<i64: 2>, scalar_prefetch = 0 : i64, scratch_operands = 0 : i64, tpu.core_type = #tpu.core_type<tc>, window_params = [{transform_indices = @transform_0, window_bounds = array<i64: 2>}, {transform_indices = @transform_1, window_bounds = array<i64: 16, 128>}, {pipeline_mode = #tpu.pipeline_mode<synchronous>, transform_indices = @transform_2, window_bounds = array<i64: 128, 256>}, {pipeline_mode = #tpu.pipeline_mode<synchronous>, transform_indices = @transform_3, window_bounds = array<i64: 1, 256>}, {pipeline_mode = #tpu.pipeline_mode<synchronous>, transform_indices = @transform_4, window_bounds = array<i64: 3, 128>}, {pipeline_mode = #tpu.pipeline_mode<synchronous>, transform_indices = @transform_5, window_bounds = array<i64: 1, 128>}, {pipeline_mode = #tpu.pipeline_mode<synchronous>, transform_indices = @transform_6, window_bounds = array<i64: 128, 128>}, {pipeline_mode = #tpu.pipeline_mode<synchronous>, transform_indices = @transform_7, window_bounds = array<i64: 1, 128>}, {transform_indices = @transform_8, window_bounds = array<i64: 16, 128>}]} {
    %c0 = arith.constant 0 : index
    %c0_0 = arith.constant 0 : index
    %0 = vector.load %arg2[%c0, %c0_0] : memref<16x128xf32, #tpu.memory_space<vmem>>, vector<16x128xf32>
    %1 = arith.truncf %0 : vector<16x128xf32> to vector<16x128xbf16>
    %c0_1 = arith.constant 0 : index
    %c0_2 = arith.constant 0 : index
    %2 = vector.load %arg3[%c0_1, %c0_2] : memref<128x256xbf16, #tpu.memory_space<vmem>>, vector<128x256xbf16>
    %cst = arith.constant dense<0.000000e+00> : vector<16x256xf32>
    %3 = tpu.matmul %1, %2, %cst {dimension_numbers = #tpu.dot_dimension_numbers<[1], [0], [0], [1], [0, 0, 1, 1], [], []>} : vector<16x128xbf16>, vector<128x256xbf16>, vector<16x256xf32> -> vector<16x256xf32>
    %c0_3 = arith.constant 0 : index
    %c0_4 = arith.constant 0 : index
    %4 = vector.load %arg4[%c0_3, %c0_4] : memref<1x256xf32, #tpu.memory_space<vmem>>, vector<1x256xf32>
    %5 = vector.broadcast %4 : vector<1x256xf32> to vector<16x256xf32>
    %6 = arith.addf %3, %5 : vector<16x256xf32>
    %7 = vector.extract_strided_slice %6 {offsets = [0, 0], sizes = [16, 128], strides = [1, 1]} : vector<16x256xf32> to vector<16x128xf32>
    %8 = vector.extract_strided_slice %6 {offsets = [0, 128], sizes = [16, 128], strides = [1, 1]} : vector<16x256xf32> to vector<16x128xf32>
    %9 = tpu.iota {dimensions = array<i32: 0>} : vector<16x1xi32>
    %c16_i32 = arith.constant 16 : i32
    %c0_i32 = arith.constant 0 : i32
    %10 = arith.cmpi eq, %c16_i32, %c0_i32 : i32
    %c1_i32 = arith.constant 1 : i32
    %11 = arith.select %10, %c1_i32, %c16_i32 : i32
    %12 = vector.broadcast %11 : i32 to vector<16x1xi32>
    %13 = arith.remsi %9, %12 : vector<16x1xi32>
    %c0_i32_5 = arith.constant 0 : i32
    %14 = vector.broadcast %c0_i32_5 : i32 to vector<16x1xi32>
    %15 = arith.cmpi ne, %13, %14 : vector<16x1xi32>
    %c0_i32_6 = arith.constant 0 : i32
    %16 = vector.broadcast %c0_i32_6 : i32 to vector<16x1xi32>
    %17 = arith.cmpi slt, %13, %16 : vector<16x1xi32>
    %c0_i32_7 = arith.constant 0 : i32
    %18 = arith.cmpi slt, %11, %c0_i32_7 : i32
    %19 = vector.broadcast %18 : i1 to vector<16x1xi1>
    %20 = vector.broadcast %19 : vector<16x1xi1> to vector<16x1xi1>
    %21 = arith.xori %17, %20 : vector<16x1xi1>
    %22 = arith.andi %21, %15 : vector<16x1xi1>
    %23 = vector.broadcast %11 : i32 to vector<16x1xi32>
    %24 = arith.addi %13, %23 : vector<16x1xi32>
    %25 = arith.select %22, %24, %13 : vector<16x1xi1>, vector<16x1xi32>
    %c2 = arith.constant 2 : index
    %c0_8 = arith.constant 0 : index
    %26 = vector.load %arg5[%c2, %c0_8] : memref<3x128xf32, #tpu.memory_space<vmem>>, vector<1x128xf32>
    %27 = vector.shape_cast %26 : vector<1x128xf32> to vector<128xf32>
    %28 = vector.shape_cast %27 : vector<128xf32> to vector<1x128xf32>
    %29 = vector.broadcast %28 : vector<1x128xf32> to vector<16x128xf32>
    %30 = arith.mulf %7, %29 : vector<16x128xf32>
    %c2_i32 = arith.constant 2 : i32
    %31 = tpu.dynamic_rotate %7 by %c2_i32 dim 0 : vector<16x128xf32>, i32 -> vector<16x128xf32>
    %c2_i32_9 = arith.constant 2 : i32
    %32 = vector.broadcast %c2_i32_9 : i32 to vector<16x1xi32>
    %33 = arith.cmpi sge, %25, %32 : vector<16x1xi32>
    %cst_10 = arith.constant 0.000000e+00 : f32
    %34 = vector.shape_cast %33 : vector<16x1xi1> to vector<16x1xi1>
    %35 = vector.broadcast %34 : vector<16x1xi1> to vector<16x128xi1>
    %36 = vector.broadcast %cst_10 : f32 to vector<16x128xf32>
    %37 = arith.select %35, %31, %36 : vector<16x128xi1>, vector<16x128xf32>
    %c0_11 = arith.constant 0 : index
    %c0_12 = arith.constant 0 : index
    %38 = vector.load %arg5[%c0_11, %c0_12] : memref<3x128xf32, #tpu.memory_space<vmem>>, vector<1x128xf32>
    %39 = vector.shape_cast %38 : vector<1x128xf32> to vector<128xf32>
    %40 = vector.shape_cast %39 : vector<128xf32> to vector<1x128xf32>
    %41 = vector.broadcast %40 : vector<1x128xf32> to vector<16x128xf32>
    %42 = arith.mulf %37, %41 : vector<16x128xf32>
    %43 = arith.addf %30, %42 : vector<16x128xf32>
    %c1_i32_13 = arith.constant 1 : i32
    %44 = tpu.dynamic_rotate %7 by %c1_i32_13 dim 0 : vector<16x128xf32>, i32 -> vector<16x128xf32>
    %c1_i32_14 = arith.constant 1 : i32
    %45 = vector.broadcast %c1_i32_14 : i32 to vector<16x1xi32>
    %46 = arith.cmpi sge, %25, %45 : vector<16x1xi32>
    %cst_15 = arith.constant 0.000000e+00 : f32
    %47 = vector.shape_cast %46 : vector<16x1xi1> to vector<16x1xi1>
    %48 = vector.broadcast %47 : vector<16x1xi1> to vector<16x128xi1>
    %49 = vector.broadcast %cst_15 : f32 to vector<16x128xf32>
    %50 = arith.select %48, %44, %49 : vector<16x128xi1>, vector<16x128xf32>
    %c1 = arith.constant 1 : index
    %c0_16 = arith.constant 0 : index
    %51 = vector.load %arg5[%c1, %c0_16] : memref<3x128xf32, #tpu.memory_space<vmem>>, vector<1x128xf32>
    %52 = vector.shape_cast %51 : vector<1x128xf32> to vector<128xf32>
    %53 = vector.shape_cast %52 : vector<128xf32> to vector<1x128xf32>
    %54 = vector.broadcast %53 : vector<1x128xf32> to vector<16x128xf32>
    %55 = arith.mulf %50, %54 : vector<16x128xf32>
    %56 = arith.addf %43, %55 : vector<16x128xf32>
    %c0_17 = arith.constant 0 : index
    %c0_18 = arith.constant 0 : index
    %57 = vector.load %arg6[%c0_17, %c0_18] : memref<1x128xf32, #tpu.memory_space<vmem>>, vector<1x128xf32>
    %58 = vector.broadcast %57 : vector<1x128xf32> to vector<16x128xf32>
    %59 = arith.addf %56, %58 : vector<16x128xf32>
    %60 = arith.mulf %59, %8 : vector<16x128xf32>
    %61 = arith.truncf %60 : vector<16x128xf32> to vector<16x128xbf16>
    %c0_19 = arith.constant 0 : index
    %c0_20 = arith.constant 0 : index
    %62 = vector.load %arg7[%c0_19, %c0_20] : memref<128x128xbf16, #tpu.memory_space<vmem>>, vector<128x128xbf16>
    %cst_21 = arith.constant dense<0.000000e+00> : vector<16x128xf32>
    %63 = tpu.matmul %61, %62, %cst_21 {dimension_numbers = #tpu.dot_dimension_numbers<[1], [0], [0], [1], [0, 0, 1, 1], [], []>} : vector<16x128xbf16>, vector<128x128xbf16>, vector<16x128xf32> -> vector<16x128xf32>
    %c0_22 = arith.constant 0 : index
    %c0_23 = arith.constant 0 : index
    %64 = vector.load %arg8[%c0_22, %c0_23] : memref<1x128xf32, #tpu.memory_space<vmem>>, vector<1x128xf32>
    %65 = vector.broadcast %64 : vector<1x128xf32> to vector<16x128xf32>
    %66 = arith.addf %63, %65 : vector<16x128xf32>
    %c0_24 = arith.constant 0 : index
    %67 = memref.load %arg1[%c0_24] : memref<2xf32, #tpu.memory_space<smem>>
    %68 = vector.broadcast %67 : f32 to vector<16x128xf32>
    %69 = arith.mulf %68, %66 : vector<16x128xf32>
    %c1_25 = arith.constant 1 : index
    %70 = memref.load %arg1[%c1_25] : memref<2xf32, #tpu.memory_space<smem>>
    %71 = vector.broadcast %70 : f32 to vector<16x128xf32>
    %72 = arith.mulf %71, %0 : vector<16x128xf32>
    %73 = arith.addf %69, %72 : vector<16x128xf32>
    %74 = arith.truncf %73 : vector<16x128xf32> to vector<16x128xbf16>
    %c0_26 = arith.constant 0 : index
    %c0_27 = arith.constant 0 : index
    %75 = vector.load %arg9[%c0_26, %c0_27] : memref<16x128xbf16, #tpu.memory_space<vmem>>, vector<16x128xbf16>
    tpu.vector_store %arg9[%c0_26, %c0_27], %74 {strides = array<i32>} : memref<16x128xbf16, #tpu.memory_space<vmem>>, vector<16x128xbf16>,
    return
  }
  func.func @transform_0(%arg0: i32) -> i32 {
    %c0_i32 = arith.constant 0 : i32
    %c0_i32_0 = arith.constant 0 : i32
    return %c0_i32 : i32
  }
  func.func @transform_1(%arg0: i32) -> (i32, i32) {
    %c0_i32 = arith.constant 0 : i32
    %c0_i32_0 = arith.constant 0 : i32
    return %arg0, %c0_i32 : i32, i32
  }
  func.func @transform_2(%arg0: i32) -> (i32, i32) {
    %c0_i32 = arith.constant 0 : i32
    %c0_i32_0 = arith.constant 0 : i32
    %c0_i32_1 = arith.constant 0 : i32
    return %c0_i32, %c0_i32_0 : i32, i32
  }
  func.func @transform_3(%arg0: i32) -> (i32, i32) {
    %c0_i32 = arith.constant 0 : i32
    %c0_i32_0 = arith.constant 0 : i32
    %c0_i32_1 = arith.constant 0 : i32
    return %c0_i32, %c0_i32_0 : i32, i32
  }
  func.func @transform_4(%arg0: i32) -> (i32, i32) {
    %c0_i32 = arith.constant 0 : i32
    %c0_i32_0 = arith.constant 0 : i32
    %c0_i32_1 = arith.constant 0 : i32
    return %c0_i32, %c0_i32_0 : i32, i32
  }
  func.func @transform_5(%arg0: i32) -> (i32, i32) {
    %c0_i32 = arith.constant 0 : i32
    %c0_i32_0 = arith.constant 0 : i32
    %c0_i32_1 = arith.constant 0 : i32
    return %c0_i32, %c0_i32_0 : i32, i32
  }
  func.func @transform_6(%arg0: i32) -> (i32, i32) {
    %c0_i32 = arith.constant 0 : i32
    %c0_i32_0 = arith.constant 0 : i32
    %c0_i32_1 = arith.constant 0 : i32
    return %c0_i32, %c0_i32_0 : i32, i32
  }
  func.func @transform_7(%arg0: i32) -> (i32, i32) {
    %c0_i32 = arith.constant 0 : i32
    %c0_i32_0 = arith.constant 0 : i32
    %c0_i32_1 = arith.constant 0 : i32
    return %c0_i32, %c0_i32_0 : i32, i32
  }
  func.func @transform_8(%arg0: i32) -> (i32, i32) {
    %c0_i32 = arith.constant 0 : i32
    %c0_i32_0 = arith.constant 0 : i32
    return %arg0, %c0_i32 : i32, i32
  }
}

</mosaic_0001>

<bundles_post_ra>
// kernel: tpu_custom_call.1
= control target key start
LH: loop header
LB: loop body
LE: loop exit
PB: predicated region body
PF: predicated region fallthrough
CT: control target
= control target key end

     0   :  { %s1552_s0 = inlined_call_operand.hbm [shape: f32[2], index: 0, kind: input, shape index: {}]   ;;  %s1553_s1 = inlined_call_operand.hbm [shape: f32[32,128], index: 1, kind: input, shape index: {}]   ;;  %s1554_s2 = inlined_call_operand.hbm [shape: bf16[128,256], index: 2, kind: input, shape index: {}]   ;;  %s1555_s3 = inlined_call_operand.vmem [shape: f32[1,256], index: 3, kind: input, shape index: {}]   ;;  %s1556_s4 = inlined_call_operand.hbm [shape: f32[3,128], index: 4, kind: input, shape index: {}]   ;;  %s1557_s5 = inlined_call_operand.vmem [shape: f32[1,128], index: 5, kind: input, shape index: {}]   ;;  %s1558_s6 = inlined_call_operand.hbm [shape: bf16[128,128], index: 6, kind: input, shape index: {}]   ;;  %s1559_s7 = inlined_call_operand.vmem [shape: f32[1,128], index: 7, kind: input, shape index: {}]   ;;  %s1560_s8 = inlined_call_operand.hbm [shape: bf16[32,128], index: 8, kind: output, shape index: {}]  }
   0x1   :  { %1563 = sst [smem:[#allocation18_spill]] %s1552_s0 }
   0x2   :  { %1564 = sst [smem:[#allocation19_spill]] %s1554_s2 }
   0x3   :  { %13 = vsyncpa [#allocation5], 0 }
   0x4   :  { %14 = vsyncpa [#allocation3], 0 }
   0x5   :  { %16 = vsyncpa [#allocation3 + $0x1], 0 }
   0x6   :  { %17 = vsyncpa [#allocation8], 0 }
   0x7   :  { %18 = vsyncpa [#allocation11], 0 }
   0x8   :  { %19 = vsyncpa [#allocation4], 0 }
   0x9   :  { %21 = vsyncpa [#allocation4 + $0x1], 0  ;;  %s1345_s27 = smov 0   ;;  %s1347_s28 = smov 0  }
   0xa   :  { %s1349_s29 = smov 0   ;;  %s1351_s30 = smov 0  }
   0xb LB: > { %s1366_s9 = sadd.s32 4294967295, %s1288_s30   ;;  %s827_s10 = sadd.s32 4294967294, %s1288_s30   ;;  %s1288_s30 = sphi %s1351_s30, %s1583_s30   ;;  %s1284_s29 = sphi %s1349_s29, %s1582_s29   ;;  %s1280_s28 = sphi %s1347_s28, %s1581_s28   ;;  %s1276_s27 = sphi %s1345_s27, %s1580_s27  }
   0xc   : > { %p68_p0 = scmp.ne.s32.totalorder %s1280_s28, %s1276_s27  ;;  %p69_p1 = scmp.eq.s32.totalorder %s1366_s9, 0 }
   0xd   : > { %p218_p2 = scmp.eq.s32.totalorder %s1366_s9, 1  ;;  %p224_p3 = scmp.eq.s32.totalorder %s827_s10, 1 }
   0xe   : > { %p1375_p4 = por %p69_p1, %p68_p0  ;;  %p828_p5 = scmp.ge.s32.totalorder %s1288_s30, 1 }
   0xf   : > { %p1380_p6 = por %p224_p3, %p68_p0  ;;  %p231_p7 = scmp.lt.s32.totalorder %s1288_s30, 3 }
  0x10   : > { %s1567_s2 = sld [smem:[#allocation19_spill]]  ;;  %s1290_s17 = smov [#allocation7]  }
  0x11   : > { %p1388_p8 = pnand %p828_p5, %p231_p7  ;;  %s254_s18 = sshll.u32 %s1290_s17, 4  ;;  %s255_s18 = int_to_ptr.vmem [resolvable:$true] %s254_s18 }
  0x12   : > { %s1570_s0 = sld [smem:[#allocation18_spill]]  ;;  %s1561_s23 = smov 128  }
  0x13   : > { %p997_p9 = pneg %p1388_p8  ;;  %s1562_s24 = smov 8  }
  0x14   : > { %s1293_s25 = smov [#allocation2]   ;;  %s270_s13 = sshll.u32 %s1556_s4, 4  ;;  %s271_s13 = int_to_ptr.hbm [resolvable:$true] %s270_s13 }
  0x15   : > { %p1396_p10 = pnand %p997_p9, %p69_p1  ;;  %s1294_s14 = smov [#allocation9]  }
  0x16   : > { %s252_s15 = sshll.u32 %s1567_s2, 4  ;;  %s272_s17 = sshll.u32 %s1294_s14, 4  ;;  %s253_s15 = int_to_ptr.hbm [resolvable:$true] %s252_s15  ;;  %s273_s17 = int_to_ptr.vmem [resolvable:$true] %s272_s17 }
  0x17   : > { %1003 = dma.hbm_to_vmem [thread:$0]  (!%p1396_p10), %s253_s15, 2048, %s255_s18, [#allocation8], %s1561_s23, %s1561_s23, %s1562_s24  }
  0x18   : > { %s243_s22 = sshll.u32 %s1570_s0, 4  ;;  %s284_s18 = sshll.u32 %s1558_s6, 4  ;;  %s244_s22 = int_to_ptr.hbm [resolvable:$true] %s243_s22  ;;  %s285_s18 = int_to_ptr.hbm [resolvable:$true] %s284_s18 }
  0x19   : > { %1000 = dma.hbm_to_smem (!%p1396_p10), %s244_s22, 16, %s1293_s25, [#allocation5]  }
  0x1a   : > { %1006 = dma.hbm_to_vmem [thread:$0]  (!%p1396_p10), %s271_s13, 64, %s273_s17, [#allocation8]  }
  0x1b   : > { %s1295_s21 = smov [#allocation10]   ;;  %s1296_s25 = smov 64  }
  0x1c   : > { %s286_s22 = sshll.u32 %s1295_s21, 4  ;;  %s1297_s26 = smov 4   ;;  %s287_s22 = int_to_ptr.vmem [resolvable:$true] %s286_s22 }
  0x1d   : > { %1009 = dma.hbm_to_vmem [thread:$0]  (!%p1396_p10), %s285_s18, 1024, %s287_s22, [#allocation11], %s1296_s25, %s1296_s25, %s1297_s26  }
  0x1e   : > { %s1422_s10 = sadd.s32 1, %s1288_s30   ;;  %s55_s20 = sadd.s32 1, %s1284_s29 }
  0x1f   : > { %s52_s14 = ssub.s32 %s1288_s30, %s1422_s10  ;;  %p62_p13 = scmp.ne.s32.totalorder %s1284_s29, %s1280_s28 }
  0x20   : > { %p53_p12 = scmp.eq.s32.totalorder %s52_s14, 0  ;;  %p63_p0 = scmp.eq.s32.totalorder %s1288_s30, 0 }
  0x21   : > { %p1435_p5 = por %p218_p2, %p62_p13  ;;  %p1022_p7 = scmp.lt.s32.totalorder %s1288_s30, 2 }
  0x22   : > { %s1431_s13 = scalar_select %p53_p12, %s1284_s29, %s55_s20  }
  0x23   : > { %p64_p3 = por %p63_p0, %p62_p13  ;;  %s303_s15 = sand.u32 1, %s1284_s29  }
  0x24   : > { %s834_s19 = sshll.u32 %s303_s15, 4  ;;  %s946_s18 = sshll.u32 %s1288_s30, 4 }
  0x25   : > { %s312_s25 = scalar_lea.hbm %s1553_s1, %s946_s18  ;;  %s307_s26 = scalar_lea.vmem [#allocation6], %s834_s19 }
  0x26   : > { %s315_s14 = sshll.u32 %s307_s26, 4  ;;  %s313_s23 = sshll.u32 %s312_s25, 4  ;;  %s316_s14 = int_to_ptr.vmem [resolvable:$true] %s315_s14  ;;  %s314_s23 = int_to_ptr.hbm [resolvable:$true] %s313_s23 }
  0x27   : > { %p1445_p9 = pnand %p1022_p7, %p64_p3  ;;  %s304_s24 = scalar_lea.sflag [#allocation3], %s303_s15 }
  0x28   : > { %s1180_s0 = sshra.s32 %s314_s23, 4  ;;  %s1187_s21 = scalar_lea.hbm %s1553_s1, 32  ;;  %s1181_s0 = int_to_ptr.hbm [resolvable:$true] %s1180_s0 }
  0x29   : > { %s1182_s2 = scalar_lea.hbm %s1181_s0, 16  ;;  %p1184_p10 = pneg %p1445_p9 }
  0x2a   : > { %p1183_p2 = scmp.ne.s32.totalorder %s1181_s0, %s1182_s2  ;;  %p1188_p0 = scmp.lt.s32.totalorder %s1181_s0, %s1553_s1 }
  0x2b   : > { %p1189_p3 = scmp.lt.s32.totalorder %s1187_s21, %s1182_s2 }
  0x2c   : > { %p1185_p12 = pnand %p1184_p10, %p1183_p2 }
  0x2d   : > { %p1190_p7 = por %p1189_p3, %p1188_p0 }
  0x2e   : > { %p1186_p13 = pneg %p1185_p12 }
  0x30   : > { %p1191_p11 = pnand %p1190_p7, %p1186_p13 }
  0x32   : > { %1194 = shalt.err (!%p1191_p11)
}
  0x33   : > { %s1573_s15 = smov 8   ;;  %s1574_s26 = smov 128  }
  0x34   : > { %1013 = dma.hbm_to_vmem [thread:$0]  (!%p1445_p9), %s314_s23, 256, %s316_s14, %s304_s24, %s1574_s26, %s1574_s26, %s1573_s15  }
  0x35   : > { %327 = sbr.rel (%p1388_p8) target bundleno = 407 (0x197), region = 52 }
  0x3a   : > { %1255 = dma.done.wait (%p69_p1), [#allocation5], 16  }
  0x3b   : > { %1257 = vsyncadd (%p69_p1), [#allocation5], 4294967280  ;;  %s1469_s0 = sand.u32 1, %s1280_s28  }
  0x3c   : > { %s839_s2 = sshll.u32 %s1469_s0, 4  ;;  %s335_s20 = scalar_lea.sflag [#allocation3], %s1469_s0 }
  0x3d   : > { %s1473_s18 = scalar_lea.vmem [#allocation6], %s839_s2 }
  0x3e   : > { %1259 = dma.done.wait (%p1375_p4), %s335_s20, 256  }
  0x3f   : > { %1261 = vsyncadd (%p1375_p4), %s335_s20, 4294967040 }
  0x40   : > { %1263 = dma.done.wait (%p69_p1), [#allocation8], 2112  }
  0x41   : > { %1265 = vsyncadd (%p69_p1), [#allocation8], 4294965184 }
  0x42   : > { %1267 = dma.done.wait (%p69_p1), [#allocation11], 1024  }
  0x43   : > { %1269 = vsyncadd (%p69_p1), [#allocation11], 4294966272 }
  0x44   : > { %359 = sfence }
  0x45   : > { %v902_v0 = vld [vmem:[#allocation7 + $0x70] sm:$0xf]  ;;  %v962_v1 = vld [vmem:[#allocation7 + $0x74] sm:$0xf0]  ;;  %v894_v2 = vld [vmem:[#allocation7 + $0x60] sm:$0xf]  ;;  %v523_v59 = vlaneseq }
  0x46   : > { %v903_v3 = vor.u32 %v962_v1, %v902_v0  ;;  %v960_v4 = vld [vmem:[#allocation7 + $0x64] sm:$0xf0]  ;;  %v961_v5 = vld [vmem:[#allocation7 + $0x74] sm:$0xf]  ;;  %v904_v6 = vld [vmem:[#allocation7 + $0x78] sm:$0xf0] }
  0x47   : > { %v907_v7 = vor.u32 %v961_v5, %v904_v6  ;;  %v959_v8 = vld [vmem:[#allocation7 + $0x64] sm:$0xf]  ;;  %v895_v9 = vor.u32 %v960_v4, %v894_v2  ;;  %v896_v10 = vld [vmem:[#allocation7 + $0x68] sm:$0xf0]  ;;  %v886_v11 = vld [vmem:[#allocation7 + $0x50] sm:$0xf] }
  0x48   : > { %495 = vmatpush.bf16.msra.mxu0 %v903_v3  ;;  %v958_v12 = vld [vmem:[#allocation7 + $0x54] sm:$0xf0]  ;;  %v899_v13 = vor.u32 %v959_v8, %v896_v10  ;;  %v957_v14 = vld [vmem:[#allocation7 + $0x54] sm:$0xf]  ;;  %v888_v15 = vld [vmem:[#allocation7 + $0x58] sm:$0xf0] }
  0x49   : > { %509 = vmatpush.bf16.msra.mxu1 %v907_v7  ;;  %v887_v16 = vor.u32 %v958_v12, %v886_v11  ;;  %v878_v17 = vld [vmem:[#allocation7 + $0x40] sm:$0xf]  ;;  %v956_v18 = vld [vmem:[#allocation7 + $0x44] sm:$0xf0]  ;;  %v891_v19 = vor.u32 %v957_v14, %v888_v15  ;;  %v955_v20 = vld [vmem:[#allocation7 + $0x44] sm:$0xf] }
  0x4a   : > { %v880_v21 = vld [vmem:[#allocation7 + $0x48] sm:$0xf0]  ;;  %v870_v22 = vld [vmem:[#allocation7 + $0x30] sm:$0xf]  ;;  %v879_v23 = vor.u32 %v956_v18, %v878_v17  ;;  %v954_v24 = vld [vmem:[#allocation7 + $0x34] sm:$0xf0] }
  0x4b   : > { %v953_v25 = vld [vmem:[#allocation7 + $0x34] sm:$0xf]  ;;  %v970_v26 = vld [vmem:[#allocation10 + $0x38] sm:$0xff]  ;;  %v883_v27 = vor.u32 %v955_v20, %v880_v21  ;;  %v871_v29 = vor.u32 %v954_v24, %v870_v22  ;;  %v952_v31 = vld [vmem:[#allocation7 + $0x24] sm:$0xf0]  ;;  %v524_v62 = vshrl.u32 %v523_v59, 7 }
  0x4c   : > { %496 = vmatpush.bf16.msra.mxu0 %v895_v9  ;;  %v872_v28 = vld [vmem:[#allocation7 + $0x38] sm:$0xf0]  ;;  %669 = vmatpush.bf16.msra.mxu2 %v970_v26  ;;  %v862_v30 = vld [vmem:[#allocation7 + $0x20] sm:$0xf]  ;;  %v951_v33 = vld [vmem:[#allocation7 + $0x24] sm:$0xf] }
  0x4d   : > { %510 = vmatpush.bf16.msra.mxu1 %v899_v13  ;;  %v875_v32 = vor.u32 %v953_v25, %v872_v28  ;;  %v864_v34 = vld [vmem:[#allocation7 + $0x28] sm:$0xf0]  ;;  %v863_v35 = vor.u32 %v952_v31, %v862_v30  ;;  %v854_v36 = vld [vmem:[#allocation7 + $0x10] sm:$0xf]  ;;  %v950_v37 = vld [vmem:[#allocation7 + $0x14] sm:$0xf0] }
  0x4e   : > { %v867_v38 = vor.u32 %v951_v33, %v864_v34  ;;  %v949_v39 = vld [vmem:[#allocation7 + $0x14] sm:$0xf]  ;;  %v856_v40 = vld [vmem:[#allocation7 + $0x18] sm:$0xf0]  ;;  %v855_v41 = vor.u32 %v950_v37, %v854_v36  ;;  %v846_v42 = vld [vmem:[#allocation7] sm:$0xf] }
  0x4f   : > { %v948_v43 = vld [vmem:[#allocation7 + $0x4] sm:$0xf0]  ;;  %v859_v44 = vor.u32 %v949_v39, %v856_v40  ;;  %v947_v45 = vld [vmem:[#allocation7 + $0x4] sm:$0xf]  ;;  %v848_v46 = vld [vmem:[#allocation7 + $0x8] sm:$0xf0] }
  0x50   : > { %497 = vmatpush.bf16.msra.mxu0 %v887_v16  ;;  %v847_v47 = vor.u32 %v948_v43, %v846_v42  ;;  %v1488_v48 = vld [vmem:[%s1473_s18] sm:$0xff]  ;;  %v1491_v49 = vld [vmem:[%s1473_s18 + $0x8] sm:$0xff]  ;;  %v851_v50 = vor.u32 %v947_v45, %v848_v46  ;;  %v530_v0 = vand.u32 15, %v524_v62  ;;  %vm556_vm0 = vcmp.lt.s32.totalorder %v524_v62, 2  ;;  %s940_s14 = sld [smem:[#allocation2 + $0x1]]  ;;  %s843_s25 = sshll.u32 %s1469_s0, 3 }
  0x51   : > { %511 = vmatpush.bf16.msra.mxu1 %v891_v19  ;;  %v392_v51 = vpack.c.bf16 %v1491_v49, %v1488_v48  ;;  %v969_v52 = vld [vmem:[#allocation10 + $0x30] sm:$0xff]  ;;  %v968_v53 = vld [vmem:[#allocation10 + $0x28] sm:$0xff]  ;;  %v967_v54 = vld [vmem:[#allocation10 + $0x20] sm:$0xff]  ;;  %vm575_vm2 = vcmp.lt.s32.totalorder %v524_v62, 1  ;;  %s683_s19 = sld [smem:[#allocation2]]  ;;  %s971_s15 = sshll.u32 %s1366_s9, 3 }
  0x52   : > { %670 = vmatpush.bf16.msra.mxu2 %v969_v52  ;;  %v966_v55 = vld [vmem:[#allocation10 + $0x18] sm:$0xff]  ;;  %v965_v56 = vld [vmem:[#allocation10 + $0x10] sm:$0xff]  ;;  %v964_v57 = vld [vmem:[#allocation10 + $0x8] sm:$0xff]  ;;  %vm1498_vm1 = vcmp.ge.s32.totalorder %v530_v0, 2  ;;  %vm1502_vm3 = vcmp.ge.s32.totalorder %v530_v0, 1  ;;  %s709_s20 = scalar_lea.hbm %s1560_s8, %s971_s15  ;;  %s387_s18 = scalar_lea.vmem [#allocation12], %s843_s25 }
  0x53   : > { %v963_v58 = vld [vmem:[#allocation10] sm:$0xff]  ;;  %v409_v60 = vld [vmem:[%s1555_s3] sm:$0x3]  ;;  %v1070_v8 = vld [vmem:[#allocation9 + $0x2] ss:$0 sm:$0xff]  ;;  %s710_s11 = sshll.u32 %s387_s18, 4  ;;  %s711_s11 = int_to_ptr.vmem [resolvable:$true] %s710_s11 }
  0x54   : > { %498 = vmatpush.bf16.msra.mxu0 %v879_v23  ;;  %v411_v63 = vperm.slane %v409_v60, 0  ;;  %v1071_v6 = vld [vmem:[#allocation9] ss:$0 sm:$0xff]  ;;  %v1072_v13 = vld [vmem:[#allocation9 + $0x1] ss:$0 sm:$0xff]  ;;  %v412_v24 = vperm.slane %v409_v60, 1 }
  0x55   : > { %512 = vmatpush.bf16.msra.mxu1 %v883_v27  ;;  %v1073_v27 = vld [vmem:[%s1557_s5] ss:$0 sm:$0xff]  ;;  %s712_s16 = sshll.u32 %s709_s20, 4  ;;  %s698_s9 = scalar_lea.sflag [#allocation4], %s1469_s0  ;;  %s713_s16 = int_to_ptr.hbm [resolvable:$true] %s712_s16 }
  0x56   : > { %671 = vmatpush.bf16.msra.mxu2 %v968_v53  ;;  %v688_v43 = vstv %s940_s14  ;;  %s1224_s23 = sshra.s32 %s713_s16, 4  ;;  %s1230_s21 = scalar_lea.hbm %s1560_s8, 16  ;;  %s1225_s23 = int_to_ptr.hbm [resolvable:$true] %s1224_s23 }
  0x57   : > { %v689_v46 = vmul.f32 %v688_v43, %v1488_v48  ;;  %s1226_s24 = scalar_lea.hbm %s1225_s23, 8  ;;  %p1231_p11 = scmp.lt.s32.totalorder %s1225_s23, %s1560_s8 }
  0x58   : > { %499 = vmatpush.bf16.msra.mxu0 %v871_v29  ;;  %p1227_p1 = scmp.ne.s32.totalorder %s1225_s23, %s1226_s24  ;;  %p1232_p9 = scmp.lt.s32.totalorder %s1230_s21, %s1226_s24 }
  0x59   : > { %513 = vmatpush.bf16.msra.mxu1 %v875_v32 }
  0x5a   : > { %672 = vmatpush.bf16.msra.mxu2 %v967_v54  ;;  %p1228_p4 = pnand %p1227_p1, %p1435_p5  ;;  %p1233_p2 = por %p1232_p9, %p1231_p11 }
  0x5c   : > { %500 = vmatpush.bf16.msra.mxu0 %v863_v35  ;;  %p1229_p8 = pneg %p1228_p4 }
  0x5d   : > { %514 = vmatpush.bf16.msra.mxu1 %v867_v38 }
  0x5e   : > { %673 = vmatpush.bf16.msra.mxu2 %v966_v55  ;;  %p1234_p10 = pnand %p1233_p2, %p1229_p8 }
  0x60   : > { %501 = vmatpush.bf16.msra.mxu0 %v855_v41  ;;  %v1074_v41 = vld [vmem:[%s1559_s7] ss:$0 sm:$0xff] }
  0x61   : > { %515 = vmatpush.bf16.msra.mxu1 %v859_v44  ;;  %v684_v44 = vstv %s683_s19 }
  0x62   : > { %674 = vmatpush.bf16.msra.mxu2 %v965_v56 }
  0x64   : > { %502 = vmatpush.bf16.msra.mxu0 %v847_v47  ;;  %v690_v47 = vmul.f32 %v688_v43, %v1491_v49 }
  0x65   : > { %516 = vmatpush.bf16.msra.mxu1 %v851_v50 }
  0x66   : > { %675 = vmatpush.bf16.msra.mxu2 %v964_v57 }
  0x67   : > { %503 = vmatmul.bf16.vlgmr.msra.gmra.mxu0 %v392_v51 }
  0x68   : > { %517 = vmatmul.bf16.vlgmr.msra.gmra.mxu1 %v392_v51 }
  0x6a   : > { %676 = vmatpush.bf16.msra.mxu2 %v963_v58 }
  0xe4   : > { %v504_v61 = vpop.f32.mrf.mxu0 }
  0xe5   : > { %v505_v1 = vadd.f32 %v504_v61, %v411_v63  ;;  %v518_v2 = vpop.f32.mrf.mxu1 }
  0xe6   : > { %v519_v35 = vadd.f32 %v518_v2, %v412_v24 }
  0xe7   : > { %v554_v9 = vrot.slane %v505_v1, 6  ;;  %v573_v10 = vrot.slane %v505_v1, 7  ;;  %v552_v22 = vmul.f32 %v1070_v8, %v505_v1 }
  0xec   : > { %v506_v3 = vpop.f32.mrf.mxu0 }
  0xed   : > { %v507_v4 = vadd.f32 %v506_v3, %v411_v63  ;;  %v520_v28 = vpop.f32.mrf.mxu1 }
  0xee   : > { %v521_v33 = vadd.f32 %v520_v28, %v412_v24 }
  0xef   : > { %v555_v11 = vrot.slane %v507_v4, 6  ;;  %v574_v12 = vrot.slane %v507_v4, 7  ;;  %v553_v18 = vmul.f32 %v1070_v8, %v507_v4 }
  0xf1   : > { %v557_v14 = vsel %vm556_vm0, %v554_v9, %v555_v11  ;;  %v558_v15 = vsel %vm556_vm0, %v555_v11, %v554_v9  ;;  %v577_v16 = vsel %vm575_vm2, %v574_v12, %v573_v10  ;;  %v576_v17 = vsel %vm575_vm2, %v573_v10, %v574_v12 }
  0xf2   : > { %v565_v19 = vsel %vm1498_vm1, %v558_v15, 0.0  ;;  %v570_v20 = vmul.f32 %v1071_v6, %v557_v14  ;;  %v584_v21 = vsel %vm1502_vm3, %v577_v16, 0.0  ;;  %v589_v26 = vmul.f32 %v1072_v13, %v576_v17 }
  0xf3   : > { %v569_v23 = vmul.f32 %v1071_v6, %v565_v19  ;;  %v588_v30 = vmul.f32 %v1072_v13, %v584_v21 }
  0xf4   : > { %v572_v25 = vadd.f32 %v570_v20, %v553_v18 }
  0xf5   : > { %v571_v29 = vadd.f32 %v569_v23, %v552_v22 }
  0xf6   : > { %v591_v31 = vadd.f32 %v589_v26, %v572_v25 }
  0xf7   : > { %v590_v32 = vadd.f32 %v588_v30, %v571_v29 }
  0xf8   : > { %v597_v34 = vadd.f32 %v1073_v27, %v591_v31 }
  0xf9   : > { %v596_v36 = vadd.f32 %v1073_v27, %v590_v32 }
  0xfa   : > { %v599_v37 = vmul.f32 %v597_v34, %v521_v33 }
  0xfb   : > { %v598_v38 = vmul.f32 %v596_v36, %v519_v35 }
  0xfd   : > { %v600_v39 = vpack.c.bf16 %v599_v37, %v598_v38 }
  0xff   : > { %677 = vmatmul.bf16.vlgmr.msra.gmra.mxu2 %v600_v39 }
 0x182   : > { %v678_v40 = vpop.f32.mrf.mxu2 }
 0x183   : > { %v679_v42 = vadd.f32 %v1074_v41, %v678_v40 }
 0x185   : > { %v685_v50 = vmul.f32 %v684_v44, %v679_v42 }
 0x187   : > { %v691_v53 = vadd.f32 %v689_v46, %v685_v50 }
 0x18a   : > { %v680_v45 = vpop.f32.mrf.mxu2 }
 0x18b   : > { %v681_v51 = vadd.f32 %v1074_v41, %v680_v45 }
 0x18d   : > { %v686_v52 = vmul.f32 %v684_v44, %v681_v51 }
 0x18f   : > { %v692_v54 = vadd.f32 %v690_v47, %v686_v52 }
 0x191   : > { %v975_v55 = vpack.c.bf16 %v692_v54, %v691_v53 }
 0x193   : > { %976 = vst [vmem:[%s387_s18] sm:$0xff] %v975_v55  }
 0x194   : > { %1237 = shalt.err (!%p1234_p10)
}
 0x195   : > { %s1298_s0 = smov 64   ;;  %s1299_s15 = smov 4  }
 0x196   : > { %995 = dma.vmem_to_hbm [thread:$0]  (%p1435_p5), %s711_s11, 128, %s713_s16, %s698_s9, %s1298_s0, %s1298_s0, %s1299_s15  }
 0x197 PF: > { %s727_s26 = sand.u32 1, %s1276_s27   ;;  %p1579_p12 = scmp.ge.s32.totalorder %s1288_s30, 2 }
 0x198   : > { %s728_s2 = scalar_lea.sflag [#allocation4], %s727_s26 }
 0x199   : > { %p1015_p13 = pnand %p1579_p12, %p1380_p6 }
 0x19b   : > { %p1016_p0 = pneg %p1015_p13 }
 0x19d   : > { %1271 = dma.done.wait (%p1016_p0), %s728_s2, 128  }
 0x19e   : > { %1273 = vsyncadd (%p1016_p0), %s728_s2, 4294967168  ;;  %p24_p3 = scmp.ge.s32.totalorder %s1422_s10, 4   ;;  %s1580_s27 = smov %s1280_s28 }
 0x19f   : > { %s1581_s28 = smov %s1284_s29  ;;  %s1582_s29 = smov %s1431_s13 }
 0x1a0   : > { %s1583_s30 = smov %s1422_s10  ;;  %26 = sbr.rel (!%p24_p3) target bundleno = 11 (0xb), region = 114 }
 0x1a5   :  { %734 = vsyncpa [#allocation3], 1 }
 0x1a6   :  { %736 = vsyncpa [#allocation3 + $0x1], 1 }
 0x1a7   :  { %737 = vsyncpa [#allocation8], 1 }
 0x1a8   :  { %738 = vsyncpa [#allocation11], 1 }
 0x1a9   :  { %739 = vsyncpa [#allocation4], 1 }
 0x1aa   :  { %741 = vsyncpa [#allocation4 + $0x1], 1 }
 0x1ab   :  { %742 = vsyncpa [#allocation5], 1 }
 0x1ac   :  { %744 = vsyncpa [#allocation5 + $0x1], 1 }

</bundles_post_ra>
